<compile_context>
chip_gen: v7x
topology: tpu7x:2x2x1
jax: 0.10.0
libtpu: 0.0.40
codegen_flags: <defaults>
</compile_context>

<pallas_src>
import functools

import jax
import jax.numpy as jnp
from jax.experimental import pallas as pl
from jax.experimental.pallas import tpu as pltpu

LN_EPS = 1e-5
LANES = 128


# ---------------------------------------------------------------------------
# Fused kernel: [LayerNorm -> Linear -> ReLU -> residual] * num_layers -> Linear
# ---------------------------------------------------------------------------
def make_ff_kernel(num_layers, *, layer_norm=True, residual=True, activation="relu"):
    act = {"relu": lambda v: jnp.maximum(v, 0.0), "tanh": jnp.tanh}[activation]

    def kernel(*refs):
        # refs = x, (gamma, beta, w, b) * num_layers, out_w, out_b, o
        x_ref = refs[0]
        o_ref = refs[-1]
        layer_refs = refs[1:1 + 4 * num_layers]
        ow_ref = refs[1 + 4 * num_layers]
        ob_ref = refs[2 + 4 * num_layers]

        x = x_ref[...].astype(jnp.float32)                       # [TB, D]

        # Static Python loop (num_layers is fixed at trace time).
        for l in range(num_layers):
            g_ref, be_ref, w_ref, b_ref = layer_refs[4 * l:4 * l + 4]
            # Load each weight once into locals (hoisted broadcasts).
            gamma = g_ref[...]
            beta = be_ref[...]
            w = w_ref[...]
            b = b_ref[...]

            h_in = x
            if layer_norm:
                mean = jnp.mean(h_in, axis=-1, keepdims=True)
                centered = h_in - mean
                var = jnp.mean(centered * centered, axis=-1, keepdims=True)
                h_in = centered * jax.lax.rsqrt(var + LN_EPS) * gamma + beta

            h = jnp.dot(h_in, w, preferred_element_type=jnp.float32) + b
            h = act(h)
            # dropout_rate == 0 -> identity (eval-mode semantics).
            x = x + h if residual else h

        y = jnp.dot(x, ow_ref[...], preferred_element_type=jnp.float32) + ob_ref[...]
        o_ref[...] = y.astype(o_ref.dtype)                        # lane-dense store

    return kernel


def ff_forward(x, params, *, layer_norm=True, residual=True, activation="relu",
               max_tile_rows=512):
    """Single fused pallas_call for the whole FF stack."""
    B, D = x.shape
    num_layers = len(params["hidden"])
    O = params["out_w"].shape[1]
    d_last = params["out_w"].shape[0]

    # Lane-dense output: pad output features up to a multiple of 128.
    OP = max(LANES, ((O + LANES - 1) // LANES) * LANES)
    out_w_p = jnp.zeros((d_last, OP), params["out_w"].dtype).at[:, :O].set(params["out_w"])
    out_b_p = jnp.zeros((1, OP), params["out_b"].dtype).at[:, :O].set(params["out_b"])

    # Batch tile: multiple of 8 sublanes, capped for v7x's 64 MiB VMEM
    # (double-buffered in/out tiles stay far below the scoped default).
    if B <= 8:
        tb = B
    else:
        tb = min(((B + 7) // 8) * 8, max_tile_rows)
        tb = min(tb, B)
    grid = (pl.cdiv(B, tb),)

    # Flatten inputs: x, per-layer (gamma, beta, w, b), out_w, out_b.
    inputs = [x]
    in_specs = [pl.BlockSpec((tb, D), lambda i: (i, 0))]
    for layer in params["hidden"]:
        for name in ("gamma", "beta", "w", "b"):
            arr = layer[name]
            inputs.append(arr)
            # Full-shape block, constant index_map -> weight stays resident in VMEM.
            in_specs.append(pl.BlockSpec(arr.shape, lambda i: (0, 0)))
    inputs += [out_w_p, out_b_p]
    in_specs += [pl.BlockSpec(out_w_p.shape, lambda i: (0, 0)),
                 pl.BlockSpec(out_b_p.shape, lambda i: (0, 0))]

    out_specs = pl.BlockSpec((tb, OP), lambda i: (i, 0))

    # Advisory cost estimate for XLA scheduling of the tiny custom call.
    H = params["hidden"][0]["w"].shape[1] if num_layers else D
    flops = num_layers * (2 * B * D * H + 10 * B * D) + 2 * B * d_last * OP
    weight_bytes = sum(int(a.size) * a.dtype.itemsize for a in inputs[1:])
    bytes_accessed = int(x.size) * x.dtype.itemsize + weight_bytes + B * OP * 4
    cost = pl.CostEstimate(flops=int(flops),
                           transcendentals=int(num_layers * B),
                           bytes_accessed=int(bytes_accessed))

    y_pad = pl.pallas_call(
        make_ff_kernel(num_layers, layer_norm=layer_norm,
                       residual=residual, activation=activation),
        out_shape=jax.ShapeDtypeStruct((B, OP), x.dtype),
        grid=grid,
        in_specs=in_specs,
        out_specs=out_specs,
        compiler_params=pltpu.CompilerParams(
            dimension_semantics=("parallel",)),
        cost_estimate=cost,
    )(*inputs)

    return y_pad[:, :O]


# ---------------------------------------------------------------------------
# Pure-JAX reference for verification.
# ---------------------------------------------------------------------------
def ff_reference(x, params):
    for layer in params["hidden"]:
        mean = jnp.mean(x, axis=-1, keepdims=True)
        var = jnp.mean((x - mean) ** 2, axis=-1, keepdims=True)
        ln = (x - mean) / jnp.sqrt(var + LN_EPS) * layer["gamma"] + layer["beta"]
        h = jnp.maximum(ln @ layer["w"] + layer["b"], 0.0)
        x = x + h
    return x @ params["out_w"] + params["out_b"]


def init_params(key, dim_input, dim_hidden, dim_output, num_layers):
    params = {"hidden": []}
    d_in = dim_input
    for _ in range(num_layers):
        key, kw, kb = jax.random.split(key, 3)
        params["hidden"].append(
            dict(
                gamma=jnp.ones((1, d_in), jnp.float32),
                beta=jnp.zeros((1, d_in), jnp.float32),
                # stored as [in, out] (torch Linear weight transposed)
                w=jax.random.normal(kw, (d_in, dim_hidden), jnp.float32) * 0.1,
                b=jax.random.normal(kb, (1, dim_hidden), jnp.float32) * 0.1,
            )
        )
        d_in = dim_hidden
    key, kw, kb = jax.random.split(key, 3)
    params["out_w"] = jax.random.normal(kw, (d_in, dim_output), jnp.float32) * 0.1
    params["out_b"] = jax.random.normal(kb, (1, dim_output), jnp.float32) * 0.1
    return params

# TODO(synk): dropout_rate > 0 (training-mode dropout) not implemented; this
# config uses dropout_rate=0 which matches eval-mode semantics exactly.


if __name__ == "__main__":
    B, D_IN, D_HID, D_OUT, N_LAYERS = 8, 32, 32, 16, 2

    key = jax.random.PRNGKey(0)
    key, kx = jax.random.split(key)
    x = jax.random.normal(kx, (B, D_IN), jnp.float32)
    params = init_params(key, D_IN, D_HID, D_OUT, N_LAYERS)

    fwd = jax.jit(functools.partial(ff_forward, layer_norm=True,
                                    residual=True, activation="relu"))
    y = jax.block_until_ready(fwd(x, params))

    y_ref = ff_reference(x, params)
    assert y.shape == (B, D_OUT)
    assert jnp.allclose(y, y_ref, atol=1e-4, rtol=1e-4), "mismatch vs reference"

    print("KERNEL_OK")
</pallas_src>

<mosaic_0001>
module attributes {stable_mosaic.version = 11 : i64} {
  func.func @kernel(%arg0: i32, %arg1: memref<8x32xf32, #tpu.memory_space<vmem>>, %arg2: memref<1x32xf32, #tpu.memory_space<vmem>>, %arg3: memref<1x32xf32, #tpu.memory_space<vmem>>, %arg4: memref<32x32xf32, #tpu.memory_space<vmem>>, %arg5: memref<1x32xf32, #tpu.memory_space<vmem>>, %arg6: memref<1x32xf32, #tpu.memory_space<vmem>>, %arg7: memref<1x32xf32, #tpu.memory_space<vmem>>, %arg8: memref<32x32xf32, #tpu.memory_space<vmem>>, %arg9: memref<1x32xf32, #tpu.memory_space<vmem>>, %arg10: memref<32x128xf32, #tpu.memory_space<vmem>>, %arg11: memref<1x128xf32, #tpu.memory_space<vmem>>, %arg12: memref<8x128xf32, #tpu.memory_space<vmem>>) attributes {dimension_semantics = [#tpu.dimension_semantics<parallel>], iteration_bounds = array<i64: 1>, scalar_prefetch = 0 : i64, scratch_operands = 0 : i64, tpu.core_type = #tpu.core_type<tc>, window_params = [{transform_indices = @transform_0, window_bounds = array<i64: 8, 32>}, {pipeline_mode = #tpu.pipeline_mode<synchronous>, transform_indices = @transform_1, window_bounds = array<i64: 1, 32>}, {pipeline_mode = #tpu.pipeline_mode<synchronous>, transform_indices = @transform_2, window_bounds = array<i64: 1, 32>}, {pipeline_mode = #tpu.pipeline_mode<synchronous>, transform_indices = @transform_3, window_bounds = array<i64: 32, 32>}, {pipeline_mode = #tpu.pipeline_mode<synchronous>, transform_indices = @transform_4, window_bounds = array<i64: 1, 32>}, {pipeline_mode = #tpu.pipeline_mode<synchronous>, transform_indices = @transform_5, window_bounds = array<i64: 1, 32>}, {pipeline_mode = #tpu.pipeline_mode<synchronous>, transform_indices = @transform_6, window_bounds = array<i64: 1, 32>}, {pipeline_mode = #tpu.pipeline_mode<synchronous>, transform_indices = @transform_7, window_bounds = array<i64: 32, 32>}, {pipeline_mode = #tpu.pipeline_mode<synchronous>, transform_indices = @transform_8, window_bounds = array<i64: 1, 32>}, {pipeline_mode = #tpu.pipeline_mode<synchronous>, transform_indices = @transform_9, window_bounds = array<i64: 32, 128>}, {pipeline_mode = #tpu.pipeline_mode<synchronous>, transform_indices = @transform_10, window_bounds = array<i64: 1, 128>}, {transform_indices = @transform_11, window_bounds = array<i64: 8, 128>}]} {
    %c0 = arith.constant 0 : index
    %c0_0 = arith.constant 0 : index
    %0 = vector.load %arg1[%c0, %c0_0] : memref<8x32xf32, #tpu.memory_space<vmem>>, vector<8x32xf32>
    %c0_1 = arith.constant 0 : index
    %c0_2 = arith.constant 0 : index
    %1 = vector.load %arg2[%c0_1, %c0_2] : memref<1x32xf32, #tpu.memory_space<vmem>>, vector<1x32xf32>
    %c0_3 = arith.constant 0 : index
    %c0_4 = arith.constant 0 : index
    %2 = vector.load %arg3[%c0_3, %c0_4] : memref<1x32xf32, #tpu.memory_space<vmem>>, vector<1x32xf32>
    %c0_5 = arith.constant 0 : index
    %c0_6 = arith.constant 0 : index
    %3 = vector.load %arg4[%c0_5, %c0_6] : memref<32x32xf32, #tpu.memory_space<vmem>>, vector<32x32xf32>
    %c0_7 = arith.constant 0 : index
    %c0_8 = arith.constant 0 : index
    %4 = vector.load %arg5[%c0_7, %c0_8] : memref<1x32xf32, #tpu.memory_space<vmem>>, vector<1x32xf32>
    %cst = arith.constant dense<0.000000e+00> : vector<8xf32>
    %5 = vector.multi_reduction <add>, %0, %cst [1] : vector<8x32xf32> to vector<8xf32>
    %6 = vector.shape_cast %5 : vector<8xf32> to vector<8x1xf32>
    %cst_9 = arith.constant 3.200000e+01 : f32
    %7 = vector.broadcast %cst_9 : f32 to vector<8x1xf32>
    %8 = arith.divf %6, %7 : vector<8x1xf32>
    %9 = vector.broadcast %8 : vector<8x1xf32> to vector<8x32xf32>
    %10 = arith.subf %0, %9 : vector<8x32xf32>
    %11 = arith.mulf %10, %10 : vector<8x32xf32>
    %cst_10 = arith.constant dense<0.000000e+00> : vector<8xf32>
    %12 = vector.multi_reduction <add>, %11, %cst_10 [1] : vector<8x32xf32> to vector<8xf32>
    %13 = vector.shape_cast %12 : vector<8xf32> to vector<8x1xf32>
    %cst_11 = arith.constant 3.200000e+01 : f32
    %14 = vector.broadcast %cst_11 : f32 to vector<8x1xf32>
    %15 = arith.divf %13, %14 : vector<8x1xf32>
    %cst_12 = arith.constant 9.99999974E-6 : f32
    %16 = vector.broadcast %cst_12 : f32 to vector<8x1xf32>
    %17 = arith.addf %15, %16 : vector<8x1xf32>
    %18 = math.rsqrt %17 : vector<8x1xf32>
    %19 = vector.broadcast %18 : vector<8x1xf32> to vector<8x32xf32>
    %20 = arith.mulf %10, %19 : vector<8x32xf32>
    %21 = vector.broadcast %1 : vector<1x32xf32> to vector<8x32xf32>
    %22 = arith.mulf %20, %21 : vector<8x32xf32>
    %23 = vector.broadcast %2 : vector<1x32xf32> to vector<8x32xf32>
    %24 = arith.addf %22, %23 : vector<8x32xf32>
    %cst_13 = arith.constant dense<0.000000e+00> : vector<8x32xf32>
    %25 = tpu.matmul %24, %3, %cst_13 {dimension_numbers = #tpu.dot_dimension_numbers<[1], [0], [0], [1], [0, 0, 1, 1], [], []>} : vector<8x32xf32>, vector<32x32xf32>, vector<8x32xf32> -> vector<8x32xf32>
    %26 = vector.broadcast %4 : vector<1x32xf32> to vector<8x32xf32>
    %27 = arith.addf %25, %26 : vector<8x32xf32>
    %cst_14 = arith.constant 0.000000e+00 : f32
    %28 = vector.broadcast %cst_14 : f32 to vector<8x32xf32>
    %29 = arith.maximumf %27, %28 : vector<8x32xf32>
    %30 = arith.addf %0, %29 : vector<8x32xf32>
    %c0_15 = arith.constant 0 : index
    %c0_16 = arith.constant 0 : index
    %31 = vector.load %arg6[%c0_15, %c0_16] : memref<1x32xf32, #tpu.memory_space<vmem>>, vector<1x32xf32>
    %c0_17 = arith.constant 0 : index
    %c0_18 = arith.constant 0 : index
    %32 = vector.load %arg7[%c0_17, %c0_18] : memref<1x32xf32, #tpu.memory_space<vmem>>, vector<1x32xf32>
    %c0_19 = arith.constant 0 : index
    %c0_20 = arith.constant 0 : index
    %33 = vector.load %arg8[%c0_19, %c0_20] : memref<32x32xf32, #tpu.memory_space<vmem>>, vector<32x32xf32>
    %c0_21 = arith.constant 0 : index
    %c0_22 = arith.constant 0 : index
    %34 = vector.load %arg9[%c0_21, %c0_22] : memref<1x32xf32, #tpu.memory_space<vmem>>, vector<1x32xf32>
    %cst_23 = arith.constant dense<0.000000e+00> : vector<8xf32>
    %35 = vector.multi_reduction <add>, %30, %cst_23 [1] : vector<8x32xf32> to vector<8xf32>
    %36 = vector.shape_cast %35 : vector<8xf32> to vector<8x1xf32>
    %cst_24 = arith.constant 3.200000e+01 : f32
    %37 = vector.broadcast %cst_24 : f32 to vector<8x1xf32>
    %38 = arith.divf %36, %37 : vector<8x1xf32>
    %39 = vector.broadcast %38 : vector<8x1xf32> to vector<8x32xf32>
    %40 = arith.subf %30, %39 : vector<8x32xf32>
    %41 = arith.mulf %40, %40 : vector<8x32xf32>
    %cst_25 = arith.constant dense<0.000000e+00> : vector<8xf32>
    %42 = vector.multi_reduction <add>, %41, %cst_25 [1] : vector<8x32xf32> to vector<8xf32>
    %43 = vector.shape_cast %42 : vector<8xf32> to vector<8x1xf32>
    %cst_26 = arith.constant 3.200000e+01 : f32
    %44 = vector.broadcast %cst_26 : f32 to vector<8x1xf32>
    %45 = arith.divf %43, %44 : vector<8x1xf32>
    %cst_27 = arith.constant 9.99999974E-6 : f32
    %46 = vector.broadcast %cst_27 : f32 to vector<8x1xf32>
    %47 = arith.addf %45, %46 : vector<8x1xf32>
    %48 = math.rsqrt %47 : vector<8x1xf32>
    %49 = vector.broadcast %48 : vector<8x1xf32> to vector<8x32xf32>
    %50 = arith.mulf %40, %49 : vector<8x32xf32>
    %51 = vector.broadcast %31 : vector<1x32xf32> to vector<8x32xf32>
    %52 = arith.mulf %50, %51 : vector<8x32xf32>
    %53 = vector.broadcast %32 : vector<1x32xf32> to vector<8x32xf32>
    %54 = arith.addf %52, %53 : vector<8x32xf32>
    %cst_28 = arith.constant dense<0.000000e+00> : vector<8x32xf32>
    %55 = tpu.matmul %54, %33, %cst_28 {dimension_numbers = #tpu.dot_dimension_numbers<[1], [0], [0], [1], [0, 0, 1, 1], [], []>} : vector<8x32xf32>, vector<32x32xf32>, vector<8x32xf32> -> vector<8x32xf32>
    %56 = vector.broadcast %34 : vector<1x32xf32> to vector<8x32xf32>
    %57 = arith.addf %55, %56 : vector<8x32xf32>
    %cst_29 = arith.constant 0.000000e+00 : f32
    %58 = vector.broadcast %cst_29 : f32 to vector<8x32xf32>
    %59 = arith.maximumf %57, %58 : vector<8x32xf32>
    %60 = arith.addf %30, %59 : vector<8x32xf32>
    %c0_30 = arith.constant 0 : index
    %c0_31 = arith.constant 0 : index
    %61 = vector.load %arg10[%c0_30, %c0_31] : memref<32x128xf32, #tpu.memory_space<vmem>>, vector<32x128xf32>
    %cst_32 = arith.constant dense<0.000000e+00> : vector<8x128xf32>
    %62 = tpu.matmul %60, %61, %cst_32 {dimension_numbers = #tpu.dot_dimension_numbers<[1], [0], [0], [1], [0, 0, 1, 1], [], []>} : vector<8x32xf32>, vector<32x128xf32>, vector<8x128xf32> -> vector<8x128xf32>
    %c0_33 = arith.constant 0 : index
    %c0_34 = arith.constant 0 : index
    %63 = vector.load %arg11[%c0_33, %c0_34] : memref<1x128xf32, #tpu.memory_space<vmem>>, vector<1x128xf32>
    %64 = vector.broadcast %63 : vector<1x128xf32> to vector<8x128xf32>
    %65 = arith.addf %62, %64 : vector<8x128xf32>
    %c0_35 = arith.constant 0 : index
    %c0_36 = arith.constant 0 : index
    %66 = vector.load %arg12[%c0_35, %c0_36] : memref<8x128xf32, #tpu.memory_space<vmem>>, vector<8x128xf32>
    tpu.vector_store %arg12[%c0_35, %c0_36], %65 {strides = array<i32>} : memref<8x128xf32, #tpu.memory_space<vmem>>, vector<8x128xf32>,
    return
  }
  func.func @transform_0(%arg0: i32) -> (i32, i32) {
    %c0_i32 = arith.constant 0 : i32
    %c0_i32_0 = arith.constant 0 : i32
    return %arg0, %c0_i32 : i32, i32
  }
  func.func @transform_1(%arg0: i32) -> (i32, i32) {
    %c0_i32 = arith.constant 0 : i32
    %c0_i32_0 = arith.constant 0 : i32
    %c0_i32_1 = arith.constant 0 : i32
    return %c0_i32, %c0_i32_0 : i32, i32
  }
  func.func @transform_2(%arg0: i32) -> (i32, i32) {
    %c0_i32 = arith.constant 0 : i32
    %c0_i32_0 = arith.constant 0 : i32
    %c0_i32_1 = arith.constant 0 : i32
    return %c0_i32, %c0_i32_0 : i32, i32
  }
  func.func @transform_3(%arg0: i32) -> (i32, i32) {
    %c0_i32 = arith.constant 0 : i32
    %c0_i32_0 = arith.constant 0 : i32
    %c0_i32_1 = arith.constant 0 : i32
    return %c0_i32, %c0_i32_0 : i32, i32
  }
  func.func @transform_4(%arg0: i32) -> (i32, i32) {
    %c0_i32 = arith.constant 0 : i32
    %c0_i32_0 = arith.constant 0 : i32
    %c0_i32_1 = arith.constant 0 : i32
    return %c0_i32, %c0_i32_0 : i32, i32
  }
  func.func @transform_5(%arg0: i32) -> (i32, i32) {
    %c0_i32 = arith.constant 0 : i32
    %c0_i32_0 = arith.constant 0 : i32
    %c0_i32_1 = arith.constant 0 : i32
    return %c0_i32, %c0_i32_0 : i32, i32
  }
  func.func @transform_6(%arg0: i32) -> (i32, i32) {
    %c0_i32 = arith.constant 0 : i32
    %c0_i32_0 = arith.constant 0 : i32
    %c0_i32_1 = arith.constant 0 : i32
    return %c0_i32, %c0_i32_0 : i32, i32
  }
  func.func @transform_7(%arg0: i32) -> (i32, i32) {
    %c0_i32 = arith.constant 0 : i32
    %c0_i32_0 = arith.constant 0 : i32
    %c0_i32_1 = arith.constant 0 : i32
    return %c0_i32, %c0_i32_0 : i32, i32
  }
  func.func @transform_8(%arg0: i32) -> (i32, i32) {
    %c0_i32 = arith.constant 0 : i32
    %c0_i32_0 = arith.constant 0 : i32
    %c0_i32_1 = arith.constant 0 : i32
    return %c0_i32, %c0_i32_0 : i32, i32
  }
  func.func @transform_9(%arg0: i32) -> (i32, i32) {
    %c0_i32 = arith.constant 0 : i32
    %c0_i32_0 = arith.constant 0 : i32
    %c0_i32_1 = arith.constant 0 : i32
    return %c0_i32, %c0_i32_0 : i32, i32
  }
  func.func @transform_10(%arg0: i32) -> (i32, i32) {
    %c0_i32 = arith.constant 0 : i32
    %c0_i32_0 = arith.constant 0 : i32
    %c0_i32_1 = arith.constant 0 : i32
    return %c0_i32, %c0_i32_0 : i32, i32
  }
  func.func @transform_11(%arg0: i32) -> (i32, i32) {
    %c0_i32 = arith.constant 0 : i32
    %c0_i32_0 = arith.constant 0 : i32
    return %arg0, %c0_i32 : i32, i32
  }
}

</mosaic_0001>

<bundles_post_ra>
// kernel: ff_forward.1
= control target key start
LH: loop header
LB: loop body
LE: loop exit
PB: predicated region body
PF: predicated region fallthrough
CT: control target
= control target key end

     0   :  { %vm47_vm0 = vcmask 261120   ;;  %s631_s0 = inlined_call_operand.vmem [shape: f32[8,32], index: 0, kind: input, shape index: {}]   ;;  %s632_s1 = inlined_call_operand.vmem [shape: f32[1,32], index: 1, kind: input, shape index: {}]   ;;  %s633_s2 = inlined_call_operand.vmem [shape: f32[1,32], index: 2, kind: input, shape index: {}]   ;;  %s634_s3 = inlined_call_operand.vmem [shape: f32[32,32], index: 3, kind: input, shape index: {}]   ;;  %s635_s4 = inlined_call_operand.vmem [shape: f32[1,32], index: 4, kind: input, shape index: {}]   ;;  %s636_s5 = inlined_call_operand.vmem [shape: f32[1,32], index: 5, kind: input, shape index: {}]   ;;  %s637_s6 = inlined_call_operand.vmem [shape: f32[1,32], index: 6, kind: input, shape index: {}]   ;;  %s638_s7 = inlined_call_operand.vmem [shape: f32[32,32], index: 7, kind: input, shape index: {}]   ;;  %s639_s8 = inlined_call_operand.vmem [shape: f32[1,32], index: 8, kind: input, shape index: {}]   ;;  %s640_s9 = inlined_call_operand.vmem [shape: f32[32,128], index: 9, kind: input, shape index: {}]   ;;  %s641_s10 = inlined_call_operand.vmem [shape: f32[1,128], index: 10, kind: input, shape index: {}]   ;;  %s642_s11 = inlined_call_operand.hbm [shape: f32[8,128], index: 11, kind: output, shape index: {}]  }
   0x1   :  { %v39_v0 = vld [vmem:[%s631_s0] sm:$0xff] }
   0x2   :  { %16 = vsyncpa [#allocation3], 0  ;;  %v48_v1 = vsel %vm47_vm0, %v39_v0, 0.0  ;;  %v42_v7 = vld [vmem:[%s634_s3] sm:$0xff]  ;;  %v43_v8 = vld [vmem:[%s634_s3 + $0x8] sm:$0xff]  ;;  %v479_v10 = vmov 0.0|0.0  }
   0x3   :  { %49 = vadd.xlane.f32.xlu0 %v48_v1  ;;  %v44_v9 = vld [vmem:[%s634_s3 + $0x10] sm:$0xff]  ;;  %429 = vmatprep.subr.bf16.mxu0 %v479_v10  ;;  %v430_v11 = vpack.c.bf16 %v43_v8, %v42_v7  ;;  %v45_v12 = vld [vmem:[%s634_s3 + $0x18] sm:$0xff]  ;;  %vm480_vm1 = vmmov 0   ;;  %v481_v13 = vmov 0.0   ;;  %v371_v19 = vld [vmem:[%s632_s1] ss:$0 sm:$0xff] }
   0x4   :  { %404 = vmatprep.mubr.msk.f32.mxu0 %vm480_vm1, %v481_v13  ;;  %435 = vmatprep.subr.bf16.mxu1 %v479_v10  ;;  %v433_v14 = vpack.c.bf16 %v45_v12, %v44_v9  ;;  %v372_v21 = vld [vmem:[%s633_s2] ss:$0 sm:$0xff]  ;;  %v160_v37 = vld [vmem:[%s638_s7 + $0x8] sm:$0xff]  ;;  %v161_v38 = vld [vmem:[%s638_s7 + $0x10] sm:$0xff]  ;;  %s482_s28 = smov [#allocation2]  }
   0x5   :  { %415 = vmatprep.mubr.msk.f32.mxu1 %vm480_vm1, %v481_v13  ;;  %431 = vmatpush3.bf16.msra.mxu0 %v430_v11  ;;  %v373_v24 = vld [vmem:[%s635_s4] ss:$0 sm:$0xff]  ;;  %v162_v40 = vld [vmem:[%s638_s7 + $0x18] sm:$0xff]  ;;  %v273_v52 = vld [vmem:[%s640_s9 + $0x8] sm:$0xff]  ;;  %s363_s29 = sshll.u32 %s482_s28, 4  ;;  %s364_s29 = int_to_ptr.vmem [resolvable:$true] %s363_s29 }
   0x6   :  { %432 = vmatprep.subr.bf16.mxu0 %v479_v10  ;;  %v159_v36 = vld [vmem:[%s638_s7] sm:$0xff]  ;;  %v439_v41 = vpack.c.bf16 %v162_v40, %v161_v38  ;;  %v274_v54 = vld [vmem:[%s640_s9 + $0x10] sm:$0xff]  ;;  %v275_v55 = vld [vmem:[%s640_s9 + $0x18] sm:$0xff]  ;;  %p460_p1 = scmp.lt.s32.totalorder %s364_s29, %s364_s29 }
   0x7   :  { %v436_v39 = vpack.c.bf16 %v160_v37, %v159_v36  ;;  %v375_v46 = vld [vmem:[%s636_s5] ss:$0 sm:$0xff]  ;;  %v445_v56 = vpack.c.bf16 %v275_v55, %v274_v54 }
   0x8   :  { %v376_v48 = vld [vmem:[%s637_s6] ss:$0 sm:$0xff] }
   0x9   :  { %434 = vmatpush3.bf16.msra.mxu0 %v433_v14  ;;  %437 = vmatpush3.bf16.msra.mxu1 %v436_v39  ;;  %v272_v51 = vld [vmem:[%s640_s9] sm:$0xff]  ;;  %s455_s9 = scalar_lea.vmem %s364_s29, 128 }
   0xa   :  { %441 = vmatprep.subr.bf16.mxu0 %v479_v10  ;;  %438 = vmatprep.subr.bf16.mxu1 %v479_v10  ;;  %v442_v53 = vpack.c.bf16 %v273_v52, %v272_v51  ;;  %v377_v57 = vld [vmem:[%s639_s8] ss:$0 sm:$0xff]  ;;  %p456_p0 = scmp.ne.s32.totalorder %s364_s29, %s455_s9  ;;  %p461_p2 = scmp.lt.s32.totalorder %s455_s9, %s455_s9 }
   0xb   :  { %v379_v63 = vld [vmem:[%s641_s10] ss:$0 sm:$0xff] }
   0xc   :  { %p462_p3 = por %p461_p2, %p460_p1 }
   0xd   :  { %440 = vmatpush3.bf16.msra.mxu1 %v439_v41 }
   0xe   :  { %p463_p4 = pnand %p462_p3, %p456_p0 }
  0x90   :  { %v50_v2 = vpop.xlane.xlu0 %49 }
  0x91   :  { %v52_v3 = vmul.f32 0.03125, %v50_v2 }
  0x93   :  { %v53_v4 = vsub.f32 %v39_v0, %v52_v3 }
  0x95   :  { %v54_v5 = vmul.f32 %v53_v4, %v53_v4 }
  0x97   :  { %v55_v6 = vsel %vm47_vm0, %v54_v5, 0.0 }
  0x98   :  { %56 = vadd.xlane.f32.xlu0 %v55_v6 }
 0x125   :  { %v57_v15 = vpop.xlane.xlu0 %56 }
 0x126   :  { %v58_v16 = vmul.f32 0.03125, %v57_v15 }
 0x128   :  { %v59_v17 = vadd.f32 1e-05, %v58_v16 }
 0x12a   :  { %451 = vrsqrt.f32 %v59_v17 }
 0x134   :  { %v452_v18 = vpop.eup %451 }
 0x135   :  { %v61_v20 = vmul.f32 %v452_v18, %v53_v4 }
 0x137   :  { %v68_v22 = vmul.f32 %v371_v19, %v61_v20 }
 0x139   :  { %v75_v23 = vadd.f32 %v372_v21, %v68_v22 }
 0x13b   :  { %405 = vmatmul.mubr.msk.f32.vlgmr.msra.gmra.mrb[0].mxu0 %vm47_vm0, %v75_v23 }
 0x13c   :  { %426 = vmatprep.mubr.msk.f32.mxu0 %vm480_vm1, %v481_v13  ;;  %443 = vmatpush3.bf16.msra.mxu0 %v442_v53 }
 0x13d   :  { %444 = vmatprep.subr.bf16.mxu0 %v479_v10 }
 0x140   :  { %446 = vmatpush3.bf16.msra.mxu0 %v445_v56 }
 0x20e   :  { %v151_v25 = vpop.f32.mrb[0].mxu0 }
 0x20f   :  { %v152_v26 = vadd.f32 %v373_v24, %v151_v25  ;;  %v406_v27 = vpop.f32.mrb[1].mxu0 }
 0x211   :  { %v155_v28 = vmax.f32 %v152_v26, 0.0 }
 0x213   :  { %v156_v29 = vadd.f32 %v155_v28, %v39_v0 }
 0x215   :  { %v164_v30 = vsel %vm47_vm0, %v156_v29, 0.0 }
 0x216   :  { %165 = vadd.xlane.f32.xlu1 %v164_v30 }
 0x2a3   :  { %v166_v31 = vpop.xlane.xlu1 %165 }
 0x2a4   :  { %v167_v32 = vmul.f32 0.03125, %v166_v31 }
 0x2a6   :  { %v168_v33 = vsub.f32 %v156_v29, %v167_v32 }
 0x2a8   :  { %v169_v34 = vmul.f32 %v168_v33, %v168_v33 }
 0x2aa   :  { %v170_v35 = vsel %vm47_vm0, %v169_v34, 0.0 }
 0x2ab   :  { %171 = vadd.xlane.f32.xlu1 %v170_v35 }
 0x338   :  { %v172_v42 = vpop.xlane.xlu1 %171 }
 0x339   :  { %v173_v43 = vmul.f32 0.03125, %v172_v42 }
 0x33b   :  { %v174_v44 = vadd.f32 1e-05, %v173_v43 }
 0x33d   :  { %453 = vrsqrt.f32 %v174_v44 }
 0x347   :  { %v454_v45 = vpop.eup %453 }
 0x348   :  { %v176_v47 = vmul.f32 %v454_v45, %v168_v33 }
 0x34a   :  { %v183_v49 = vmul.f32 %v375_v46, %v176_v47 }
 0x34c   :  { %v190_v50 = vadd.f32 %v376_v48, %v183_v49 }
 0x34e   :  { %416 = vmatmul.mubr.msk.f32.vlgmr.msra.gmra.mrb[0].mxu1 %vm47_vm0, %v190_v50 }
 0x421   :  { %v266_v58 = vpop.f32.mrb[0].mxu1 }
 0x422   :  { %v267_v59 = vadd.f32 %v377_v57, %v266_v58  ;;  %v417_v60 = vpop.f32.mrb[1].mxu1 }
 0x424   :  { %v270_v61 = vmax.f32 %v267_v59, 0.0 }
 0x426   :  { %v271_v62 = vadd.f32 %v270_v61, %v156_v29 }
 0x428   :  { %427 = vmatmul.mubr.msk.f32.vlgmr.msra.gmra.mrb[2].mxu0 %vm47_vm0, %v271_v62 }
 0x4fb   :  { %v352_v0 = vpop.f32.mrb[2].mxu0 }
 0x4fc   :  { %v353_v1 = vadd.f32 %v379_v63, %v352_v0  ;;  %v428_v2 = vpop.f32.mrb[3].mxu0 }
 0x4fe   :  { %356 = vst [vmem:[#allocation2] sm:$0xff] %v353_v1 }
 0x4ff   :  { %466 = shalt.err (!%p463_p4)
}
 0x500   :  { %s467_s1 = scalar_lea.hbm %s642_s11, 128 }
 0x501   :  { %p468_p5 = scmp.ne.s32.totalorder %s642_s11, %s467_s1  ;;  %p471_p6 = scmp.lt.u32.totalorder %s467_s1, %s642_s11 }
 0x503   :  { %p473_p7 = pnand %p471_p6, %p468_p5 }
 0x505   :  { %476 = shalt.err (!%p473_p7)
}
 0x506   :  { %366 = dma.vmem_to_hbm [thread:$0]  %s364_s29, 128, %s642_s11, [#allocation3]  }
 0x507   :  { %477 = dma.done.wait [#allocation3], 128  }
 0x508   :  { %478 = vsyncadd [#allocation3], 4294967168 }
 0x509   :  { %370 = vsyncpa [#allocation3], 1 }

</bundles_post_ra>
